<compile_context>
chip_gen: v6e
topology: v6e:2x2x1
jax: 0.10.0
libtpu: 0.0.40
codegen_flags: <defaults>
</compile_context>

<pallas_src>
import functools

import jax
import jax.numpy as jnp
from jax.experimental import pallas as pl
from jax.experimental.pallas import tpu as pltpu


def _normalize_kernel(mean_ref, inv_sd_ref, x_ref, o_ref, *, row_tile, stats_resident):
    # mean_ref / inv_sd_ref: f32 stats, either fully resident (rows_padded, 1)
    #   or per-row-tile (row_tile, 1).
    # x_ref / o_ref: (row_tile, lane_tile) tiles of the flattened image.
    if stats_resident:
        r0 = pl.multiple_of(pl.program_id(0) * row_tile, row_tile)
        m = mean_ref[pl.ds(r0, row_tile), :]
        s = inv_sd_ref[pl.ds(r0, row_tile), :]
    else:
        m = mean_ref[...]
        s = inv_sd_ref[...]
    xf = x_ref[...].astype(jnp.float32)
    o_ref[...] = ((xf - m) * s).astype(o_ref.dtype)


def _pick_tile(dim: int, unit: int, target: int) -> int:
    """Block size along one dim: full extent if it fits the target, else the
    largest multiple of `unit` <= target that divides `dim` (no padded tail);
    fall back to the capped multiple (Pallas masks the partial last block)."""
    if dim <= target:
        return dim
    cap = max(unit, (target // unit) * unit)
    t = cap
    while t >= unit:
        if dim % t == 0:
            return t
        t -= unit
    return cap


def _vmem_budgets():
    """(vmem_limit_bytes, per-tile byte budget), generation-aware."""
    try:
        info = pltpu.get_tpu_info()
        cap = getattr(info, "vmem_capacity_bytes", None) or (64 << 20)
    except Exception:  # no hardware query available -> conservative default
        cap = 64 << 20
    if cap >= (96 << 20):          # v5e / v6e: 128 MiB physical VMEM per TC
        return 96 << 20, 16 << 20
    return 56 << 20, 8 << 20       # v7x: 64 MiB physical VMEM per TC


class NormalizeLayer:
    """JAX/Pallas equivalent of the PyTorch NormalizeLayer module."""

    def __init__(self, means, sds):
        # Hoisted out of the hot path: f32 channel stats and reciprocal of sd.
        self.mean_c = jnp.asarray(means, dtype=jnp.float32)
        self.inv_sd_c = 1.0 / jnp.asarray(sds, dtype=jnp.float32)
        self._fwd = jax.jit(self._forward)

    def __call__(self, x):
        return self._fwd(x)

    def _forward(self, x):
        B, C, H, W = x.shape
        rows, lanes = B * C, H * W
        itemsize = jnp.dtype(x.dtype).itemsize
        sub = max(8, 32 // itemsize)          # dtype-aware sublane unit
        vmem_limit, tile_budget = _vmem_budgets()

        # ---- tile sizing (lane axis first, then rows from the byte budget) --
        LANE_TARGET = 4096
        lane_tile = _pick_tile(lanes, 128, LANE_TARGET)
        max_tile_elems = tile_budget // itemsize
        row_target = max(sub, (max_tile_elems // max(lane_tile, 1)) // sub * sub)
        row_tile = _pick_tile(rows, sub, row_target)
        grid = (pl.cdiv(rows, row_tile), pl.cdiv(lanes, lane_tile))

        # Guarantee >= 2 "parallel" grid steps for large arrays so v7x can
        # shard work across its 2 TensorCores (no-op for tiny inputs).
        if grid == (1, 1) and rows * lanes * itemsize >= (1 << 20):
            if lanes >= 256 and lanes % 128 == 0:
                lane_tile = _pick_tile(lanes, 128, max(128, (lanes // 2 // 128) * 128))
            elif rows >= 2 * sub:
                row_tile = _pick_tile(rows, sub, max(sub, (rows // 2 // sub) * sub))
            grid = (pl.cdiv(rows, row_tile), pl.cdiv(lanes, lane_tile))

        # ---- per-row f32 stats (padded so in-kernel slices never go OOB) ----
        rows_padded = grid[0] * row_tile if rows > row_tile else rows
        mean_rows = jnp.tile(self.mean_c, (B,)).reshape(rows, 1)
        inv_rows = jnp.tile(self.inv_sd_c, (B,)).reshape(rows, 1)
        if rows_padded != rows:
            pad = rows_padded - rows
            mean_rows = jnp.pad(mean_rows, ((0, pad), (0, 0)))
            inv_rows = jnp.pad(inv_rows, ((0, pad), (0, 0)))

        stats_resident = rows_padded <= 4096
        if stats_resident:
            stat_spec = pl.BlockSpec((rows_padded, 1), lambda i, j: (0, 0))
        else:
            stat_spec = pl.BlockSpec((row_tile, 1), lambda i, j: (i, 0))

        # Free reshape for contiguous NCHW -> lane-dense 2D view.
        x2 = x.reshape(rows, lanes)

        kernel = functools.partial(
            _normalize_kernel, row_tile=row_tile, stats_resident=stats_resident
        )

        out2 = pl.pallas_call(
            kernel,
            out_shape=jax.ShapeDtypeStruct((rows, lanes), x.dtype),
            grid=grid,
            in_specs=[
                stat_spec,                                                 # mean
                stat_spec,                                                 # 1/sd
                pl.BlockSpec((row_tile, lane_tile), lambda i, j: (i, j)),  # x tile
            ],
            out_specs=pl.BlockSpec((row_tile, lane_tile), lambda i, j: (i, j)),
            compiler_params=pltpu.CompilerParams(
                dimension_semantics=("parallel", "parallel"),
                vmem_limit_bytes=vmem_limit,
            ),
            cost_estimate=pl.CostEstimate(
                flops=2 * rows * lanes,
                transcendentals=0,
                bytes_accessed=2 * rows * lanes * itemsize + 2 * rows_padded * 4,
            ),
        )(mean_rows, inv_rows, x2)

        return out2.reshape(B, C, H, W)


def normalize_layer(x, means, sds):
    """Functional one-shot wrapper (prefer constructing NormalizeLayer once)."""
    return NormalizeLayer(means, sds)(x)


if __name__ == "__main__":
    key = jax.random.PRNGKey(0)
    B, C, H, W = 2, 4, 16, 16

    x = jax.random.normal(key, (B, C, H, W), dtype=jnp.float32)

    # Deterministic per-channel statistics (matches NormalizeLayer.__init__).
    means = [0.4914, 0.4822, 0.4465, 0.5000][:C]
    sds = [0.2023, 0.1994, 0.2010, 0.2500][:C]

    layer = NormalizeLayer(means, sds)
    out = jax.block_until_ready(layer(x))

    # Verify against a plain-JAX reference of the PyTorch forward.
    means_a = jnp.asarray(means, dtype=jnp.float32)
    sds_a = jnp.asarray(sds, dtype=jnp.float32)
    ref = (x - means_a[None, :, None, None]) / sds_a[None, :, None, None]
    assert out.shape == (B, C, H, W)
    # Multiply-by-reciprocal differs from true divide only in the last ULPs.
    assert jnp.allclose(out, ref, rtol=1e-5, atol=1e-6), float(
        jnp.max(jnp.abs(out - ref))
    )

    print("KERNEL_OK")
</pallas_src>

<mosaic_0001>
module attributes {stable_mosaic.version = 11 : i64} {
  func.func @_normalize_kernel(%arg0: i32, %arg1: i32, %arg2: memref<8x1xf32, #tpu.memory_space<vmem>>, %arg3: memref<8x1xf32, #tpu.memory_space<vmem>>, %arg4: memref<8x256xf32, #tpu.memory_space<vmem>>, %arg5: memref<8x256xf32, #tpu.memory_space<vmem>>) attributes {dimension_semantics = [#tpu.dimension_semantics<parallel>, #tpu.dimension_semantics<parallel>], iteration_bounds = array<i64: 1, 1>, scalar_prefetch = 0 : i64, scratch_operands = 0 : i64, tpu.core_type = #tpu.core_type<tc>, window_params = [{pipeline_mode = #tpu.pipeline_mode<synchronous>, transform_indices = @transform_0, window_bounds = array<i64: 8, 1>}, {pipeline_mode = #tpu.pipeline_mode<synchronous>, transform_indices = @transform_1, window_bounds = array<i64: 8, 1>}, {transform_indices = @transform_2, window_bounds = array<i64: 8, 256>}, {transform_indices = @transform_3, window_bounds = array<i64: 8, 256>}]} {
    %c8_i32 = arith.constant 8 : i32
    %0 = arith.muli %arg0, %c8_i32 : i32
    %1 = tpu.assume_multiple %0, 8 : i32
    %2 = arith.index_cast %1 : i32 to index
    %c0 = arith.constant 0 : index
    %3 = vector.load %arg2[%2, %c0] : memref<8x1xf32, #tpu.memory_space<vmem>>, vector<8x1xf32>
    %4 = arith.index_cast %1 : i32 to index
    %c0_0 = arith.constant 0 : index
    %5 = vector.load %arg3[%4, %c0_0] : memref<8x1xf32, #tpu.memory_space<vmem>>, vector<8x1xf32>
    %c0_1 = arith.constant 0 : index
    %c0_2 = arith.constant 0 : index
    %6 = vector.load %arg4[%c0_1, %c0_2] : memref<8x256xf32, #tpu.memory_space<vmem>>, vector<8x256xf32>
    %7 = vector.broadcast %3 : vector<8x1xf32> to vector<8x256xf32>
    %8 = arith.subf %6, %7 : vector<8x256xf32>
    %9 = vector.broadcast %5 : vector<8x1xf32> to vector<8x256xf32>
    %10 = arith.mulf %8, %9 : vector<8x256xf32>
    %c0_3 = arith.constant 0 : index
    %c0_4 = arith.constant 0 : index
    %11 = vector.load %arg5[%c0_3, %c0_4] : memref<8x256xf32, #tpu.memory_space<vmem>>, vector<8x256xf32>
    tpu.vector_store %arg5[%c0_3, %c0_4], %10 {strides = array<i32>} : memref<8x256xf32, #tpu.memory_space<vmem>>, vector<8x256xf32>,
    return
  }
  func.func @transform_0(%arg0: i32, %arg1: i32) -> (i32, i32) {
    %c0_i32 = arith.constant 0 : i32
    %c0_i32_0 = arith.constant 0 : i32
    %c0_i32_1 = arith.constant 0 : i32
    return %c0_i32, %c0_i32_0 : i32, i32
  }
  func.func @transform_1(%arg0: i32, %arg1: i32) -> (i32, i32) {
    %c0_i32 = arith.constant 0 : i32
    %c0_i32_0 = arith.constant 0 : i32
    %c0_i32_1 = arith.constant 0 : i32
    return %c0_i32, %c0_i32_0 : i32, i32
  }
  func.func @transform_2(%arg0: i32, %arg1: i32) -> (i32, i32) {
    %c0_i32 = arith.constant 0 : i32
    return %arg0, %arg1 : i32, i32
  }
  func.func @transform_3(%arg0: i32, %arg1: i32) -> (i32, i32) {
    %c0_i32 = arith.constant 0 : i32
    return %arg0, %arg1 : i32, i32
  }
}

</mosaic_0001>

<bundles_post_ra>
// kernel: tile.1
= control target key start
LH: loop header
LB: loop body
LE: loop exit
PB: predicated region body
PF: predicated region fallthrough
CT: control target
= control target key end

     0   :  { %s35_s8 = smov 125   ;;  %vm8_vm0 = vcmask 7168   ;;  %s36_s11 = smov 126   ;;  %s62_s0 = inlined_call_operand.vmem [shape: f32[2,4], index: 0, kind: input, shape index: {}]   ;;  %s63_s1 = inlined_call_operand.vmem [shape: f32[8,1], index: 1, kind: output, shape index: {}]  }
   0x1   :  { %v5_v0 = vld [vmem:[%s62_s0] sm:$0x3]  ;;  %s34_s0 = smov 127  }
   0x2   :  { %6 = vst [vmem:[#allocation0] sm:$0x3] %v5_v0 }
   0x9   :  { %v10_v1 = vld [vmem:[#allocation0] sm:$0x3]  }
   0xa   :  { %v22_v2 = vld [vmem:[#allocation0] sm:$0x3]   ;;  %11 = vrot.lane.b32.xlu0 %v10_v1, %s34_s0 }
   0xb   :  { %23 = vrot.lane.b32.xlu1 %v22_v2, %s35_s8  ;;  %v7_v3 = vld [vmem:[#allocation0] sm:$0x3]  }
   0xc   :  { %v16_v4 = vld [vmem:[#allocation0] sm:$0x3]   ;;  %9 = vst.msk [vmem:[%s63_s1] ss:$4 sm:$0x3] %vm8_vm0, %v7_v3  }
   0xe   :  { %17 = vrot.lane.b32.xlu0 %v16_v4, %s36_s11 }
  0x7c   :  { %v12_v5 = vpop.permute.xlu0 %11  }
  0x7d   :  { %v24_v6 = vpop.permute.xlu1 %23   ;;  %28 = vst.msk [vmem:[%s63_s1 + $0x1] ss:$4 sm:$0x3] %vm8_vm0, %v12_v5  }
  0x7e   :  { %30 = vst.msk [vmem:[%s63_s1 + $0x3] ss:$4 sm:$0x3] %vm8_vm0, %v24_v6  }
  0x80   :  { %v18_v7 = vpop.permute.xlu0 %17  }
  0x81   :  { %29 = vst.msk [vmem:[%s63_s1 + $0x2] ss:$4 sm:$0x3] %vm8_vm0, %v18_v7  }

// kernel: tile.14
= control target key start
LH: loop header
LB: loop body
LE: loop exit
PB: predicated region body
PF: predicated region fallthrough
CT: control target
= control target key end

     0   :  { %s22_s0 = inlined_call_operand.vmem [shape: f32[4], index: 0, kind: input, shape index: {}]   ;;  %s23_s1 = inlined_call_operand.vmem [shape: f32[2,4], index: 1, kind: output, shape index: {}]  }
   0x1   :  { %v4_v0 = vld [vmem:[%s22_s0] ss:$0 sm:$0xff] }
   0x2   :  { %5 = vst [vmem:[%s23_s1] sm:$0x3] %v4_v0 }

// kernel: _forward.1
= control target key start
LH: loop header
LB: loop body
LE: loop exit
PB: predicated region body
PF: predicated region fallthrough
CT: control target
= control target key end

     0   :  { %v43_v0 = vmov 0   ;;  %s82_s0 = inlined_call_operand.vmem [shape: f32[8,1], index: 0, kind: input, shape index: {}]   ;;  %s83_s1 = inlined_call_operand.vmem [shape: f32[8,1], index: 1, kind: input, shape index: {}]   ;;  %s84_s2 = inlined_call_operand.vmem [shape: f32[8,256], index: 2, kind: input, shape index: {}]   ;;  %s85_s3 = inlined_call_operand.vmem [shape: f32[8,256], index: 3, kind: output, shape index: {}]  }
   0x1   :  { %42 = vset.pattern.permute.xlu0 %v43_v0  ;;  %v16_v1 = vld [vmem:[%s82_s0] sm:$0xff]  ;;  %v20_v4 = vld [vmem:[%s84_s2 + $0x8] sm:$0xff] }
   0x2   :  { %23 = vperm.xlu0 %42, %v16_v1   ;;  %v18_v2 = vld [vmem:[%s83_s1] sm:$0xff] }
   0x3   :  { %v19_v3 = vld [vmem:[%s84_s2] sm:$0xff] }
   0x6   :  { %30 = vperm.xlu0 %42, %v18_v2  }
  0x7d   :  { %v24_v5 = vpop.permute.xlu0 %23 }
  0x7e   :  { %v26_v6 = vsub.f32 %v19_v3, %v24_v5  ;;  %v27_v7 = vsub.f32 %v20_v4, %v24_v5 }
  0x81   :  { %v31_v8 = vpop.permute.xlu0 %30 }
  0x82   :  { %v33_v9 = vmul.f32 %v31_v8, %v26_v6  ;;  %v34_v10 = vmul.f32 %v31_v8, %v27_v7 }
  0x84   :  { %35 = vst [vmem:[%s85_s3] sm:$0xff] %v33_v9  ;;  %36 = vst [vmem:[%s85_s3 + $0x8] sm:$0xff] %v34_v10 }

</bundles_post_ra>
